<compile_context>
chip_gen: v6e
topology: v6e:2x2x1
jax: 0.10.0
libtpu: 0.0.40
codegen_flags: <defaults>
</compile_context>

<pallas_src>
import functools

import jax
import jax.numpy as jnp
from jax.experimental import pallas as pl
from jax.experimental.pallas import tpu as pltpu

BN_EPS = 1e-5
LANE = 128
_VMEM_LIMIT_BYTES = 32 * 1024 * 1024   # safe on v5e/v6e (128 MiB) and v7x (64 MiB)


def _round_up(n, m=LANE):
    return ((n + m - 1) // m) * m


def _choose_tile_m(m, max_tm):
    """Largest divisor of m that is <= max_tm and a multiple of 16 (bf16 sublane
    packing).  Falls back to a single full block if no such divisor exists."""
    if m <= max_tm:
        return m
    for tm in range(min(max_tm, m), 15, -1):
        if m % tm == 0 and tm % 16 == 0:
            return tm
    # TODO(synk): non-divisible M falls back to one (possibly large) block.
    return m


def _compiler_params(semantics):
    return pltpu.CompilerParams(dimension_semantics=semantics,
                                vmem_limit_bytes=_VMEM_LIMIT_BYTES)


# --------------------------------------------------------------------------
# Kernels
# --------------------------------------------------------------------------
def _accumulate_stats(stats_ref, y):
    """Accumulate per-column sum / sum-of-squares of y (f32) across the M grid."""
    i = pl.program_id(0)
    tile_stats = jnp.concatenate(
        [jnp.sum(y, axis=0, keepdims=True),
         jnp.sum(y * y, axis=0, keepdims=True)], axis=0)      # (2, 2*Cout)

    @pl.when(i == 0)
    def _():
        stats_ref[...] = tile_stats

    @pl.when(i != 0)
    def _():
        stats_ref[...] = stats_ref[...] + tile_stats


def _first_layer_kernel(x_ref, w_ref, y_ref, stats_ref):
    """ConvT(k=2,s=2) as a bf16 MXU matmul + batch-stat accumulation.

    BatchNorm of this layer is applied by the *next* kernel (needs full-M stats).
    Conv bias is omitted: training-mode BN cancels it exactly.
    """
    y = jnp.dot(x_ref[...], w_ref[...], preferred_element_type=jnp.float32)
    y_ref[...] = y.astype(y_ref.dtype)
    _accumulate_stats(stats_ref, y)


def _bn_from_stats(pstats_ref, g_ref, b_ref, *, c_prev, n_prev):
    """Turn accumulated (sum, sumsq) of the previous layer into scale/shift."""
    st = pstats_ref[...]                          # (2, 2*c_prev) f32
    s, sq = st[0:1, :], st[1:2, :]
    # Both ConvT taps (k=0, k=1) feed the same channel -> fold the two halves.
    sum_c = s[:, :c_prev] + s[:, c_prev:]         # (1, c_prev)
    sq_c = sq[:, :c_prev] + sq[:, c_prev:]
    inv_n = 1.0 / float(n_prev)
    mean = sum_c * inv_n
    var = jnp.maximum(sq_c * inv_n - mean * mean, 0.0)   # biased var (PyTorch BN)
    scale = g_ref[...] * jax.lax.rsqrt(var + BN_EPS)
    shift = b_ref[...] - mean * scale
    return scale, shift


def _bn_matmul_kernel(x_ref, pstats_ref, g_ref, b_ref, w_ref, y_ref, stats_ref,
                      *, c_prev, n_prev, apply_relu):
    """Fused [BN(prev layer) + optional ReLU] -> ConvT matmul -> stat accumulation."""
    scale, shift = _bn_from_stats(pstats_ref, g_ref, b_ref,
                                  c_prev=c_prev, n_prev=n_prev)
    xn = x_ref[...].astype(jnp.float32) * scale + shift
    if apply_relu:
        xn = jnp.maximum(xn, 0.0)
    y = jnp.dot(xn.astype(jnp.bfloat16), w_ref[...],
                preferred_element_type=jnp.float32)
    y_ref[...] = y.astype(y_ref.dtype)
    _accumulate_stats(stats_ref, y)


def _final_layer_kernel(x_ref, pstats_ref, g_ref, b_ref, w_ref, bias_ref, o_ref,
                        *, c_prev, n_prev):
    """Fused BN(layer 4, no ReLU) -> ConvT(bc, 1) + bias -> Sigmoid.

    The two ConvT taps live in lanes 0 / 1 of a 128-wide slab so the output
    store is lane-dense (unmasked).
    """
    scale, shift = _bn_from_stats(pstats_ref, g_ref, b_ref,
                                  c_prev=c_prev, n_prev=n_prev)
    xn = x_ref[...].astype(jnp.float32) * scale + shift
    y = jnp.dot(xn.astype(jnp.bfloat16), w_ref[...],
                preferred_element_type=jnp.float32) + bias_ref[...]
    o_ref[...] = jax.nn.sigmoid(y).astype(o_ref.dtype)


# --------------------------------------------------------------------------
# pallas_call wrappers (M-tiled grids, weights resident via constant index_maps)
# --------------------------------------------------------------------------
def _first_layer_call(x, w_flat, *, cout_pad, tile_m):
    m, cin_pad = x.shape
    c2 = 2 * cout_pad
    tm = _choose_tile_m(m, tile_m)
    return pl.pallas_call(
        _first_layer_kernel,
        grid=(m // tm,),
        in_specs=[
            pl.BlockSpec((tm, cin_pad), lambda i: (i, 0)),
            pl.BlockSpec((cin_pad, c2), lambda i: (0, 0)),
        ],
        out_specs=(
            pl.BlockSpec((tm, c2), lambda i: (i, 0)),
            pl.BlockSpec((2, c2), lambda i: (0, 0)),        # resident accumulator
        ),
        out_shape=(
            jax.ShapeDtypeStruct((m, c2), jnp.bfloat16),
            jax.ShapeDtypeStruct((2, c2), jnp.float32),
        ),
        compiler_params=_compiler_params(("arbitrary",)),   # stats accumulate over M
    )(x, w_flat)


def _bn_matmul_call(x, pstats, gamma, beta, w_flat, *, c_prev, n_prev, cout_pad,
                    apply_relu, tile_m):
    m, _ = x.shape
    c2 = 2 * cout_pad
    tm = _choose_tile_m(m, tile_m)
    kernel = functools.partial(_bn_matmul_kernel, c_prev=c_prev, n_prev=n_prev,
                               apply_relu=apply_relu)
    return pl.pallas_call(
        kernel,
        grid=(m // tm,),
        in_specs=[
            pl.BlockSpec((tm, c_prev), lambda i: (i, 0)),
            pl.BlockSpec((2, 2 * c_prev), lambda i: (0, 0)),
            pl.BlockSpec((1, c_prev), lambda i: (0, 0)),
            pl.BlockSpec((1, c_prev), lambda i: (0, 0)),
            pl.BlockSpec((c_prev, c2), lambda i: (0, 0)),
        ],
        out_specs=(
            pl.BlockSpec((tm, c2), lambda i: (i, 0)),
            pl.BlockSpec((2, c2), lambda i: (0, 0)),
        ),
        out_shape=(
            jax.ShapeDtypeStruct((m, c2), jnp.bfloat16),
            jax.ShapeDtypeStruct((2, c2), jnp.float32),
        ),
        compiler_params=_compiler_params(("arbitrary",)),
    )(x, pstats, gamma, beta, w_flat)


def _final_layer_call(x, pstats, gamma, beta, w_flat, bias, *, c_prev, n_prev,
                      tile_m):
    m, _ = x.shape
    ncols = w_flat.shape[1]                                  # 128 (lane-dense slab)
    tm = _choose_tile_m(m, tile_m)
    kernel = functools.partial(_final_layer_kernel, c_prev=c_prev, n_prev=n_prev)
    return pl.pallas_call(
        kernel,
        grid=(m // tm,),
        in_specs=[
            pl.BlockSpec((tm, c_prev), lambda i: (i, 0)),
            pl.BlockSpec((2, 2 * c_prev), lambda i: (0, 0)),
            pl.BlockSpec((1, c_prev), lambda i: (0, 0)),
            pl.BlockSpec((1, c_prev), lambda i: (0, 0)),
            pl.BlockSpec((c_prev, ncols), lambda i: (0, 0)),
            pl.BlockSpec((1, ncols), lambda i: (0, 0)),
        ],
        out_specs=pl.BlockSpec((tm, ncols), lambda i: (i, 0)),
        out_shape=jax.ShapeDtypeStruct((m, ncols), jnp.float32),
        # no cross-tile accumulator here -> safe to shard across v7x's 2 TCs
        compiler_params=_compiler_params(("parallel",)),
    )(x, pstats, gamma, beta, w_flat, bias)


# --------------------------------------------------------------------------
# Parameters & forward
# --------------------------------------------------------------------------
def init_generator_params(key, in_channel=1, base_channel=64, latent_dim=100):
    """Deterministic synthetic parameters, pre-padded / pre-packed for the kernels."""
    del in_channel   # the PyTorch module hardcodes the final out-channel to 1
    bc = base_channel
    cfg = [
        # (cin, cout, has_bn, relu_after_bn)
        (latent_dim, bc * 8, True, True),
        (bc * 8, bc * 4, True, True),
        (bc * 4, bc * 2, True, True),
        (bc * 2, bc, True, False),
        (bc, 1, False, False),
    ]
    params = []
    for (cin, cout, has_bn, relu) in cfg:
        key, kw, kb = jax.random.split(key, 3)
        bound = (cin * 2) ** -0.5
        # PyTorch ConvTranspose1d weight layout: (Cin, Cout, K=2)
        w = jax.random.uniform(kw, (cin, cout, 2), jnp.float32, -bound, bound)
        b = jax.random.uniform(kb, (cout,), jnp.float32, -bound, bound)
        cin_pad = _round_up(cin)
        if has_bn:
            cout_pad = _round_up(cout)
            # flat weight (Cin_pad, 2*Cout_pad), column index = k*Cout_pad + co
            wf = jnp.zeros((cin_pad, 2 * cout_pad), jnp.float32)
            wf = wf.at[:cin, :cout].set(w[:, :, 0])
            wf = wf.at[:cin, cout_pad:cout_pad + cout].set(w[:, :, 1])
            params.append(dict(
                w_flat=wf.astype(jnp.bfloat16),
                gamma=jnp.ones((1, cout_pad), jnp.float32),
                beta=jnp.zeros((1, cout_pad), jnp.float32),
                cin=cin, cout=cout, cin_pad=cin_pad, cout_pad=cout_pad,
                relu=relu, w_raw=w, b_raw=b,
            ))
        else:
            # final layer (Cout=1): taps k=0 / k=1 in lanes 0 / 1 of a 128-wide slab
            wf = jnp.zeros((cin_pad, LANE), jnp.float32)
            wf = wf.at[:cin, 0].set(w[:, 0, 0])
            wf = wf.at[:cin, 1].set(w[:, 0, 1])
            bias = jnp.zeros((1, LANE), jnp.float32).at[0, 0:2].set(b[0])
            params.append(dict(
                w_flat=wf.astype(jnp.bfloat16), bias=bias,
                cin=cin, cout=cout, cin_pad=cin_pad,
                relu=relu, w_raw=w, b_raw=b,
            ))
    return params


def generator_forward(z, params, *, tile_m=512):
    """z: (B, latent_dim, L) in PyTorch NCL layout. Returns (B, 1, L * 32)."""
    b, c_in, l = z.shape
    p0 = params[0]
    # NCL -> channel-last token matrix, zero-pad channels to 128 lanes, bf16.
    x = jnp.transpose(z, (0, 2, 1)).reshape(b * l, c_in)
    x = jnp.pad(x, ((0, 0), (0, p0["cin_pad"] - c_in))).astype(jnp.bfloat16)

    # layer 0: ConvT matmul + stat accumulation (its BN is applied by kernel 1)
    y, stats = _first_layer_call(x, p0["w_flat"], cout_pad=p0["cout_pad"],
                                 tile_m=tile_m)
    m = 2 * b * l                        # rows after the interleaving reshape
    x = y.reshape(m, p0["cout_pad"])     # free: row-major (M, 2C) == (2M, C)

    # layers 1..3: fused [BN(prev) + ReLU?] -> ConvT matmul -> stats
    for li in range(1, 4):
        prev, cur = params[li - 1], params[li]
        y, stats = _bn_matmul_call(
            x, stats, prev["gamma"], prev["beta"], cur["w_flat"],
            c_prev=prev["cout_pad"], n_prev=m, cout_pad=cur["cout_pad"],
            apply_relu=prev["relu"], tile_m=tile_m)
        m *= 2
        x = y.reshape(m, cur["cout_pad"])

    # layer 4: fused BN(layer 3, no ReLU) -> ConvT + bias -> Sigmoid
    prev, cur = params[3], params[4]
    out = _final_layer_call(
        x, stats, prev["gamma"], prev["beta"], cur["w_flat"], cur["bias"],
        c_prev=prev["cout_pad"], n_prev=m, tile_m=tile_m)

    # lanes 0/1 hold taps k=0/1 -> row-major reshape interleaves them in time
    out = out[:, :2].reshape(b, 2 * (m // b))
    return out[:, None, :]               # PyTorch NCL (B, 1, L*32)


# --------------------------------------------------------------------------
# Pure-JAX f32 reference (mirrors the PyTorch module, training-mode BN)
# --------------------------------------------------------------------------
def _reference_forward(z, params):
    x = z.astype(jnp.float32)
    for li, p in enumerate(params):
        w, bias = p["w_raw"], p["b_raw"]
        y = jnp.einsum("bct,cok->botk", x, w)                # (B, Cout, L, 2)
        bsz, cout, l_in, _ = y.shape
        y = y.reshape(bsz, cout, 2 * l_in) + bias[None, :, None]
        if li < 4:
            mean = jnp.mean(y, axis=(0, 2), keepdims=True)
            var = jnp.mean((y - mean) ** 2, axis=(0, 2), keepdims=True)  # biased
            y = (y - mean) * jax.lax.rsqrt(var + BN_EPS)     # gamma=1, beta=0
            if p["relu"]:
                y = jnp.maximum(y, 0.0)
        else:
            y = jax.nn.sigmoid(y)
        x = y
    return x


if __name__ == "__main__":
    # Small shapes consistent with the module: latent_dim=16, base_channel=8,
    # batch=2, input length=8  ->  output (2, 1, 256).
    LATENT_DIM = 16
    BASE_CHANNEL = 8
    B, L = 2, 8

    key = jax.random.PRNGKey(0)
    key_p, key_z = jax.random.split(key)
    params = init_generator_params(
        key_p, in_channel=1, base_channel=BASE_CHANNEL, latent_dim=LATENT_DIM)
    z = jax.random.normal(key_z, (B, LATENT_DIM, L), jnp.float32)

    # Small tile_m so the demo exercises multi-tile grids and the cross-tile
    # BN stat accumulation path (later layers run with grid sizes 2 and 4).
    out = jax.block_until_ready(generator_forward(z, params, tile_m=64))

    assert out.shape == (B, 1, L * 32), out.shape
    assert bool(jnp.all(jnp.isfinite(out)))
    assert bool(jnp.all((out >= 0.0) & (out <= 1.0)))        # sigmoid range

    ref = jax.block_until_ready(_reference_forward(z, params))
    max_err = float(jnp.max(jnp.abs(out - ref)))
    assert max_err < 5e-2, f"max abs err vs f32 reference = {max_err}"
    print("KERNEL_OK")
</pallas_src>

<mosaic_0001>
module attributes {stable_mosaic.version = 11 : i64} {
  func.func @_first_layer_kernel(%arg0: i32, %arg1: memref<16x128xbf16, #tpu.memory_space<vmem>>, %arg2: memref<128x256xbf16, #tpu.memory_space<vmem>>, %arg3: memref<16x256xbf16, #tpu.memory_space<vmem>>, %arg4: memref<2x256xf32, #tpu.memory_space<vmem>>) attributes {dimension_semantics = [#tpu.dimension_semantics<arbitrary>], iteration_bounds = array<i64: 1>, scalar_prefetch = 0 : i64, scratch_operands = 0 : i64, tpu.core_type = #tpu.core_type<tc>, window_params = [{transform_indices = @transform_0, window_bounds = array<i64: 16, 128>}, {pipeline_mode = #tpu.pipeline_mode<synchronous>, transform_indices = @transform_1, window_bounds = array<i64: 128, 256>}, {transform_indices = @transform_2, window_bounds = array<i64: 16, 256>}, {pipeline_mode = #tpu.pipeline_mode<synchronous>, transform_indices = @transform_3, window_bounds = array<i64: 2, 256>}]} {
    %c0 = arith.constant 0 : index
    %c0_0 = arith.constant 0 : index
    %0 = vector.load %arg1[%c0, %c0_0] : memref<16x128xbf16, #tpu.memory_space<vmem>>, vector<16x128xbf16>
    %c0_1 = arith.constant 0 : index
    %c0_2 = arith.constant 0 : index
    %1 = vector.load %arg2[%c0_1, %c0_2] : memref<128x256xbf16, #tpu.memory_space<vmem>>, vector<128x256xbf16>
    %cst = arith.constant dense<0.000000e+00> : vector<16x256xf32>
    %2 = tpu.matmul %0, %1, %cst {dimension_numbers = #tpu.dot_dimension_numbers<[1], [0], [0], [1], [0, 0, 1, 1], [], []>} : vector<16x128xbf16>, vector<128x256xbf16>, vector<16x256xf32> -> vector<16x256xf32>
    %3 = arith.truncf %2 : vector<16x256xf32> to vector<16x256xbf16>
    %c0_3 = arith.constant 0 : index
    %c0_4 = arith.constant 0 : index
    %4 = vector.load %arg3[%c0_3, %c0_4] : memref<16x256xbf16, #tpu.memory_space<vmem>>, vector<16x256xbf16>
    tpu.vector_store %arg3[%c0_3, %c0_4], %3 {strides = array<i32>} : memref<16x256xbf16, #tpu.memory_space<vmem>>, vector<16x256xbf16>,
    %cst_5 = arith.constant dense<0.000000e+00> : vector<256xf32>
    %5 = vector.multi_reduction <add>, %2, %cst_5 [0] : vector<16x256xf32> to vector<256xf32>
    %6 = vector.shape_cast %5 : vector<256xf32> to vector<1x256xf32>
    %7 = arith.mulf %2, %2 : vector<16x256xf32>
    %cst_6 = arith.constant dense<0.000000e+00> : vector<256xf32>
    %8 = vector.multi_reduction <add>, %7, %cst_6 [0] : vector<16x256xf32> to vector<256xf32>
    %9 = vector.shape_cast %8 : vector<256xf32> to vector<1x256xf32>
    %10 = tpu.concatenate %6, %9 in 0 : vector<1x256xf32>, vector<1x256xf32> -> vector<2x256xf32>
    %c0_i32 = arith.constant 0 : i32
    %11 = arith.cmpi eq, %arg0, %c0_i32 : i32
    %12 = arith.extui %11 : i1 to i32
    %c0_i32_7 = arith.constant 0 : i32
    %13 = arith.cmpi ne, %12, %c0_i32_7 : i32
    scf.if %13 {
      %c0_10 = arith.constant 0 : index
      %c0_11 = arith.constant 0 : index
      %17 = vector.load %arg4[%c0_10, %c0_11] : memref<2x256xf32, #tpu.memory_space<vmem>>, vector<2x256xf32>
      tpu.vector_store %arg4[%c0_10, %c0_11], %10 {strides = array<i32>} : memref<2x256xf32, #tpu.memory_space<vmem>>, vector<2x256xf32>,
    } else {
    }
    %c0_i32_8 = arith.constant 0 : i32
    %14 = arith.cmpi ne, %arg0, %c0_i32_8 : i32
    %15 = arith.extui %14 : i1 to i32
    %c0_i32_9 = arith.constant 0 : i32
    %16 = arith.cmpi ne, %15, %c0_i32_9 : i32
    scf.if %16 {
      %c0_10 = arith.constant 0 : index
      %c0_11 = arith.constant 0 : index
      %17 = vector.load %arg4[%c0_10, %c0_11] : memref<2x256xf32, #tpu.memory_space<vmem>>, vector<2x256xf32>
      %18 = arith.addf %17, %10 : vector<2x256xf32>
      %c0_12 = arith.constant 0 : index
      %c0_13 = arith.constant 0 : index
      %19 = vector.load %arg4[%c0_12, %c0_13] : memref<2x256xf32, #tpu.memory_space<vmem>>, vector<2x256xf32>
      tpu.vector_store %arg4[%c0_12, %c0_13], %18 {strides = array<i32>} : memref<2x256xf32, #tpu.memory_space<vmem>>, vector<2x256xf32>,
    } else {
    }
    return
  }
  func.func @transform_0(%arg0: i32) -> (i32, i32) {
    %c0_i32 = arith.constant 0 : i32
    %c0_i32_0 = arith.constant 0 : i32
    return %arg0, %c0_i32 : i32, i32
  }
  func.func @transform_1(%arg0: i32) -> (i32, i32) {
    %c0_i32 = arith.constant 0 : i32
    %c0_i32_0 = arith.constant 0 : i32
    %c0_i32_1 = arith.constant 0 : i32
    return %c0_i32, %c0_i32_0 : i32, i32
  }
  func.func @transform_2(%arg0: i32) -> (i32, i32) {
    %c0_i32 = arith.constant 0 : i32
    %c0_i32_0 = arith.constant 0 : i32
    return %arg0, %c0_i32 : i32, i32
  }
  func.func @transform_3(%arg0: i32) -> (i32, i32) {
    %c0_i32 = arith.constant 0 : i32
    %c0_i32_0 = arith.constant 0 : i32
    %c0_i32_1 = arith.constant 0 : i32
    return %c0_i32, %c0_i32_0 : i32, i32
  }
}

</mosaic_0001>

<bundles_post_ra>
// kernel: tpu_custom_call.1
= control target key start
LH: loop header
LB: loop body
LE: loop exit
PB: predicated region body
PF: predicated region fallthrough
CT: control target
= control target key end

     0   :  { %9 = vsyncpa [#allocation3], 0  ;;  %s497_s0 = inlined_call_operand.hbm [shape: bf16[16,128], index: 0, kind: input, shape index: {}]   ;;  %s498_s1 = inlined_call_operand.hbm [shape: bf16[128,256], index: 1, kind: input, shape index: {}]   ;;  %s499_s2 = inlined_call_operand.hbm [shape: bf16[16,256], index: 2, kind: output, shape index: {0}]   ;;  %s500_s3 = inlined_call_operand.hbm [shape: f32[2,256], index: 3, kind: output, shape index: {1}]  }
   0x1   :  { %10 = vsyncpa [#allocation6], 0 }
   0x2   :  { %11 = vsyncpa [#allocation4], 0 }
   0x3   :  { %12 = vsyncpa [#allocation9], 0  ;;  %s450_s12 = smov [#allocation2]  }
   0x4   :  { %s18_s13 = sshll.u32 %s450_s12, 4  ;;  %s19_s13 = int_to_ptr.vmem [resolvable:$true] %s18_s13 }
   0x5   :  { %s370_s14 = scalar_lea.vmem %s19_s13, 128  ;;  %p375_p1 = scmp.lt.s32.totalorder %s19_s13, %s19_s13 }
   0x6   :  { %p371_p0 = scmp.ne.s32.totalorder %s19_s13, %s370_s14  ;;  %p376_p2 = scmp.lt.s32.totalorder %s370_s14, %s370_s14 }
   0x8   :  { %p377_p3 = por %p376_p2, %p375_p1 }
   0xa   :  { %p378_p4 = pnand %p377_p3, %p371_p0 }
   0xc   :  { %381 = shalt.err (!%p378_p4)
}
   0xd   :  { %s451_s15 = smov 64   ;;  %s452_s16 = smov 4  }
   0xe   :  { %24 = dma.hbm_to_vmem [thread:$0]  %s497_s0, 128, %s19_s13, [#allocation3], %s451_s15, %s451_s15, %s452_s16  }
   0xf   :  { %s453_s19 = smov [#allocation5]  }
  0x10   :  { %s30_s20 = sshll.u32 %s453_s19, 4  ;;  %s31_s20 = int_to_ptr.vmem [resolvable:$true] %s30_s20 }
  0x11   :  { %s390_s21 = scalar_lea.vmem %s31_s20, 2048  ;;  %p395_p6 = scmp.lt.s32.totalorder %s31_s20, %s31_s20 }
  0x12   :  { %p391_p5 = scmp.ne.s32.totalorder %s31_s20, %s390_s21  ;;  %p396_p7 = scmp.lt.s32.totalorder %s390_s21, %s390_s21 }
  0x14   :  { %p397_p8 = por %p396_p7, %p395_p6 }
  0x16   :  { %p398_p9 = pnand %p397_p8, %p391_p5 }
  0x18   :  { %401 = shalt.err (!%p398_p9)
}
  0x19   :  { %s454_s22 = smov 128   ;;  %s455_s23 = smov 8  }
  0x1a   :  { %36 = dma.hbm_to_vmem [thread:$0]  %s498_s1, 2048, %s31_s20, [#allocation6], %s454_s22, %s454_s22, %s455_s23  }
  0x1b   :  { %442 = dma.done.wait [#allocation3], 128  }
  0x1c   :  { %443 = vsyncadd [#allocation3], 4294967168 }
  0x1d   :  { %444 = dma.done.wait [#allocation6], 2048  }
  0x1e   :  { %445 = vsyncadd [#allocation6], 4294965248  ;;  %v456_v0 = vmov 0   ;;  %v337_v1 = vld [vmem:[#allocation5 + $0x74] ss:$8 sps:$4 sm:$0xff]   ;;  %s457_s0 = smov [#allocation7]  }
  0x1f   :  { %180 = vmatprep.mubr.bf16.mxu0 %v456_v0  ;;  %v339_v2 = vld [vmem:[#allocation5 + $0x70] ss:$8 sps:$4 sm:$0xff]   ;;  %148 = vmatprep.subr.bf16.mxu0 %v337_v1  ;;  %v340_v3 = vld [vmem:[#allocation5 + $0x64] ss:$8 sps:$4 sm:$0xff]   ;;  %v342_v4 = vld [vmem:[#allocation5 + $0x60] ss:$8 sps:$4 sm:$0xff]  }
  0x20   :  { %149 = vmatpush1.bf16.msra.mxu0 %v339_v2  ;;  %v343_v5 = vld [vmem:[#allocation5 + $0x54] ss:$8 sps:$4 sm:$0xff]   ;;  %v345_v6 = vld [vmem:[#allocation5 + $0x50] ss:$8 sps:$4 sm:$0xff]   ;;  %v346_v7 = vld [vmem:[#allocation5 + $0x44] ss:$8 sps:$4 sm:$0xff]  }
  0x21   :  { %150 = vmatprep.subr.bf16.mxu0 %v340_v3  ;;  %v348_v8 = vld [vmem:[#allocation5 + $0x40] ss:$8 sps:$4 sm:$0xff]   ;;  %v349_v9 = vld [vmem:[#allocation5 + $0x34] ss:$8 sps:$4 sm:$0xff]   ;;  %v351_v10 = vld [vmem:[#allocation5 + $0x30] ss:$8 sps:$4 sm:$0xff]  }
  0x22   :  { %v352_v11 = vld [vmem:[#allocation5 + $0x24] ss:$8 sps:$4 sm:$0xff]   ;;  %v354_v12 = vld [vmem:[#allocation5 + $0x20] ss:$8 sps:$4 sm:$0xff]   ;;  %v355_v13 = vld [vmem:[#allocation5 + $0x14] ss:$8 sps:$4 sm:$0xff]  }
  0x23   :  { %v357_v14 = vld [vmem:[#allocation5 + $0x10] ss:$8 sps:$4 sm:$0xff]   ;;  %v358_v15 = vld [vmem:[#allocation5 + $0x4] ss:$8 sps:$4 sm:$0xff]   ;;  %v360_v16 = vld [vmem:[#allocation5] ss:$8 sps:$4 sm:$0xff]  }
  0x24   :  { %151 = vmatpush1.bf16.msra.mxu0 %v342_v4  ;;  %v361_v17 = vld [vmem:[#allocation2] sm:$0xff]   ;;  %s279_s1 = sshll.u32 %s457_s0, 4  ;;  %s280_s1 = int_to_ptr.vmem [resolvable:$true] %s279_s1 }
  0x25   :  { %152 = vmatprep.subr.bf16.mxu0 %v343_v5  ;;  %s402_s26 = scalar_lea.vmem %s280_s1, 256  ;;  %p407_p11 = scmp.lt.s32.totalorder %s280_s1, %s280_s1 }
  0x26   :  { %p403_p10 = scmp.ne.s32.totalorder %s280_s1, %s402_s26  ;;  %p408_p12 = scmp.lt.s32.totalorder %s402_s26, %s402_s26 }
  0x28   :  { %153 = vmatpush1.bf16.msra.mxu0 %v345_v6  ;;  %p409_p13 = por %p408_p12, %p407_p11 }
  0x29   :  { %154 = vmatprep.subr.bf16.mxu0 %v346_v7 }
  0x2a   :  { %p410_p0 = pnand %p409_p13, %p403_p10 }
  0x2c   :  { %155 = vmatpush1.bf16.msra.mxu0 %v348_v8 }
  0x2d   :  { %156 = vmatprep.subr.bf16.mxu0 %v349_v9 }
  0x30   :  { %157 = vmatpush1.bf16.msra.mxu0 %v351_v10 }
  0x31   :  { %158 = vmatprep.subr.bf16.mxu0 %v352_v11 }
  0x34   :  { %159 = vmatpush1.bf16.msra.mxu0 %v354_v12 }
  0x35   :  { %160 = vmatprep.subr.bf16.mxu0 %v355_v13 }
  0x38   :  { %161 = vmatpush1.bf16.msra.mxu0 %v357_v14 }
  0x39   :  { %162 = vmatprep.subr.bf16.mxu0 %v358_v15 }
  0x3c   :  { %163 = vmatpush1.bf16.msra.mxu0 %v360_v16 }
  0x3f   :  { %181 = vmatmul.mubr.bf16.vlgmr.msra.gmra.mxu0 %v361_v17 }
  0xff   :  { %v182_v18 = vpop.f32.mrf.mxu0 }
 0x100   :  { %v219_v22 = vmul.f32 %v182_v18, %v182_v18 }
 0x101   :  { %v184_v19 = vpop.f32.mrf.mxu0 }
 0x102   :  { %v326_v20 = vpack.c.bf16 %v184_v19, %v182_v18  ;;  %v220_v30 = vmul.f32 %v184_v19, %v184_v19 }
 0x103   :  { %v186_v21 = vpop.f32.mrf.mxu0 }
 0x104   :  { %203 = vst [vmem:[#allocation7] sm:$0xff] %v326_v20  ;;  %v205_v23 = vadd.f32 %v186_v21, %v182_v18  ;;  %v221_v24 = vmul.f32 %v186_v21, %v186_v21 }
 0x105   :  { %v188_v25 = vpop.f32.mrf.mxu0 }
 0x106   :  { %v206_v26 = vrot.slane %v205_v23, 4  ;;  %v223_v27 = vadd.f32 %v221_v24, %v219_v22  ;;  %v327_v28 = vpack.c.bf16 %v188_v25, %v186_v21  ;;  %v212_v29 = vadd.f32 %v188_v25, %v184_v19 }
 0x107   :  { %v222_v31 = vmul.f32 %v188_v25, %v188_v25 }
 0x108   :  { %v207_v32 = vadd.f32 %v206_v26, %v205_v23  ;;  %v224_v33 = vrot.slane %v223_v27, 4  ;;  %v213_v34 = vrot.slane %v212_v29, 4  ;;  %204 = vst [vmem:[#allocation7 + $0x8] sm:$0xff] %v327_v28 }
 0x109   :  { %v230_v35 = vadd.f32 %v222_v31, %v220_v30 }
 0x10a   :  { %413 = shalt.err (!%p410_p0)
}
 0x10b   :  { %285 = dma.vmem_to_hbm [thread:$0]  %s280_s1, 256, %s499_s2, [#allocation4], %s454_s22, %s454_s22, %s455_s23   ;;  %v208_v36 = vrot.slane %v207_v32, 2  ;;  %v225_v37 = vadd.f32 %v224_v33, %v223_v27  ;;  %v214_v38 = vadd.f32 %v213_v34, %v212_v29  ;;  %v231_v39 = vrot.slane %v230_v35, 4 }
 0x10c   :  { %vm237_vm0 = vcmask 1040384   ;;  %s458_s2 = smov [#allocation8]  }
 0x10d   :  { %v226_v40 = vrot.slane %v225_v37, 2  ;;  %v215_v41 = vrot.slane %v214_v38, 2  ;;  %v209_v42 = vadd.f32 %v208_v36, %v207_v32  ;;  %v232_v43 = vadd.f32 %v231_v39, %v230_v35  ;;  %s292_s29 = sshll.u32 %s458_s2, 4  ;;  %s293_s29 = int_to_ptr.vmem [resolvable:$true] %s292_s29 }
 0x10e   :  { %s422_s30 = scalar_lea.vmem %s293_s29, 64  ;;  %p427_p2 = scmp.lt.s32.totalorder %s293_s29, %s293_s29 }
 0x10f   :  { %v227_v44 = vadd.f32 %v226_v40, %v225_v37  ;;  %v216_v45 = vadd.f32 %v215_v41, %v214_v38  ;;  %v233_v46 = vrot.slane %v232_v43, 2  ;;  %v210_v48 = vrot.slane %v209_v42, 1  ;;  %p423_p1 = scmp.ne.s32.totalorder %s293_s29, %s422_s30  ;;  %p428_p3 = scmp.lt.s32.totalorder %s422_s30, %s422_s30 }
 0x111   :  { %v228_v47 = vrot.slane %v227_v44, 1  ;;  %v217_v49 = vrot.slane %v216_v45, 1  ;;  %v234_v50 = vadd.f32 %v233_v46, %v232_v43  ;;  %v211_v54 = vadd.f32 %v210_v48, %v209_v42  ;;  %p429_p4 = por %p428_p3, %p427_p2 }
 0x113   :  { %v235_v51 = vrot.slane %v234_v50, 1  ;;  %v229_v52 = vadd.f32 %v228_v47, %v227_v44  ;;  %v218_v53 = vadd.f32 %v217_v49, %v216_v45  ;;  %p430_p5 = pnand %p429_p4, %p423_p1 }
 0x115   :  { %v236_v55 = vadd.f32 %v235_v51, %v234_v50  ;;  %v238_v56 = vsel %vm237_vm0, %v211_v54, %v229_v52 }
 0x117   :  { %v239_v57 = vsel %vm237_vm0, %v218_v53, %v236_v55 }
 0x118   :  { %v246_v58 = vcombine.low %v238_v56, %v239_v57 }
 0x11a   :  { %325 = vst.sshfl [vmem:[#allocation8] sm:$0x33 pattern:$0x76325410] %v246_v58 }
 0x11b   :  { %433 = shalt.err (!%p430_p5)
}
 0x11c   :  { %295 = dma.vmem_to_hbm [thread:$0]  %s293_s29, 64, %s500_s3, [#allocation9]  }
 0x11d   :  { %446 = dma.done.wait [#allocation4], 256  }
 0x11e   :  { %447 = vsyncadd [#allocation4], 4294967040 }
 0x11f   :  { %448 = dma.done.wait [#allocation9], 64  }
 0x120   :  { %449 = vsyncadd [#allocation9], 4294967232 }
 0x121   :  { %302 = vsyncpa [#allocation3], 1 }
 0x122   :  { %303 = vsyncpa [#allocation6], 1 }
 0x123   :  { %304 = vsyncpa [#allocation4], 1 }
 0x124   :  { %305 = vsyncpa [#allocation9], 1 }

</bundles_post_ra>
